<compile_context>
chip_gen: v6e
topology: v6e:2x2x1
jax: 0.10.0
libtpu: 0.0.40
codegen_flags: <defaults>
</compile_context>

<pallas_src>
from functools import partial

import numpy as np
import jax
import jax.numpy as jnp
from jax.experimental import pallas as pl
from jax.experimental.pallas import tpu as pltpu

# --- model dimensions (from the PyTorch module) ---
L_IN   = 14              # conv1d(pad=1, stride=1) keeps length; pool(k=2,s=2) -> 7; fc1 expects 2*7
C_OUT  = 2
K      = 3
POOL_L = L_IN // 2       # 7
FLAT   = C_OUT * POOL_L  # 14
H1     = 4
NCLS   = 2

# --- packed layout constants ---
PACK  = 8                # samples packed per row (sublane group)
LANE  = 128
SLOT  = LANE // PACK     # 16 lanes of conv/pool features per sample (14 real + 2 zero)
H1P   = 8                # fc1 hidden padded 4 -> 8 lanes per sample
XCOLS = PACK * L_IN      # 112 input columns per packed row
H1COL = PACK * H1P       # 64
OCOL  = PACK * NCLS      # 16


def smallcnn_kernel(x_ref, a_ref, bconv_ref, w1_ref, b1_ref, w2_ref, b2_ref, out_ref):
    """One batch tile of TG packed rows = 8*TG samples.

    x_ref : (TG, 112) f32           a_ref : (112, 256) fused even|odd block-diag Toeplitz
    out_ref: (TG, 16)  f32 softmax probabilities, sample s / class k at lane s*2+k.
    """
    xb = x_ref[...].astype(a_ref.dtype)                                   # cast after DMA (bf16 default)
    # Conv1d as one matmul; columns [0,128) = even pooled positions, [128,256) = odd.
    z = jnp.dot(xb, a_ref[...], preferred_element_type=jnp.float32)       # (TG, 256) f32
    # ReLU/MaxPool: relu is monotone and the conv bias is shared by even/odd, so
    # relu(max(z_e + b, z_o + b)) == relu(max(z_e, z_o) + b).  Split is lane-tile aligned.
    h = jnp.maximum(jnp.maximum(z[:, :LANE], z[:, LANE:]) + bconv_ref[...], 0.0)   # (TG, 128) f32
    # fc1 + ReLU (zero-padded slot lanes of h are killed by zero rows of w1).
    h1 = jnp.maximum(
        jnp.dot(h.astype(w1_ref.dtype), w1_ref[...],
                preferred_element_type=jnp.float32) + b1_ref[...], 0.0)   # (TG, 64) f32
    # fc2 with the pairwise class difference folded in: d[s*2+k] = logit_k - logit_{1-k}.
    d = jnp.dot(h1.astype(w2_ref.dtype), w2_ref[...],
                preferred_element_type=jnp.float32) + b2_ref[...]         # (TG, 16) f32
    # Exact 2-class softmax: p_k = exp(l_k)/(exp(l_0)+exp(l_1)) = sigmoid(l_k - l_{1-k}).
    out_ref[...] = pl.reciprocal(1.0 + jnp.exp(-d), approx=False)


def build_params(w_conv, b_conv, w1_pt, b1_pt, w2_pt, b2_pt):
    """Build fused / block-diagonal / padded parameters from PyTorch-shaped weights.

    w_conv: (C_OUT,1,K) conv1.weight   b_conv: (C_OUT,) conv1.bias
    w1_pt : (H1,FLAT)   fc1.weight     b1_pt : (H1,)    fc1.bias
    w2_pt : (NCLS,H1)   fc2.weight     b2_pt : (NCLS,)  fc2.bias
    """
    w_conv = np.asarray(w_conv, np.float32); b_conv = np.asarray(b_conv, np.float32)
    w1_pt = np.asarray(w1_pt, np.float32);   b1_pt = np.asarray(b1_pt, np.float32)
    w2_pt = np.asarray(w2_pt, np.float32);   b2_pt = np.asarray(b2_pt, np.float32)

    # Fused Toeplitz, block-diagonal over the 8 packed samples.
    a_big = np.zeros((XCOLS, 2 * LANE), np.float32)
    bconv = np.zeros((1, LANE), np.float32)
    for s in range(PACK):
        for c in range(C_OUT):
            for p in range(POOL_L):
                col = s * SLOT + c * POOL_L + p
                bconv[0, col] = b_conv[c]
                for parity in (0, 1):                       # even / odd pooled candidate
                    for k in range(K):
                        i = 2 * p + parity + k - 1          # padding=1
                        if 0 <= i < L_IN:
                            a_big[s * L_IN + i, parity * LANE + col] += w_conv[c, 0, k]

    # fc1, block-diagonal; padded slot lanes (14,15 of each slot) map to zero rows.
    w1_big = np.zeros((LANE, H1COL), np.float32)
    b1_big = np.zeros((1, H1COL), np.float32)
    for s in range(PACK):
        for j in range(H1):
            b1_big[0, s * H1P + j] = b1_pt[j]
            w1_big[s * SLOT:s * SLOT + FLAT, s * H1P + j] = w1_pt[j, :]

    # fc2 with the class-pair difference folded in: column (s,k) holds W2[k]-W2[1-k].
    w2d = np.zeros((H1COL, OCOL), np.float32)
    b2d = np.zeros((1, OCOL), np.float32)
    for s in range(PACK):
        for k in range(NCLS):
            b2d[0, s * NCLS + k] = b2_pt[k] - b2_pt[1 - k]
            for j in range(H1):
                w2d[s * H1P + j, s * NCLS + k] = w2_pt[k, j] - w2_pt[1 - k, j]

    return tuple(jnp.asarray(t) for t in (a_big, bconv, w1_big, b1_big, w2d, b2d))


@partial(jax.jit, static_argnames=("group_tile", "compute_dtype"))
def smallcnn_forward(x, a_big, bconv, w1_big, b1_big, w2d, b2d, *,
                     group_tile=2048, compute_dtype=jnp.bfloat16):
    """x: (B, 1, L_IN) float32 (PyTorch NCL layout). Returns (B, NCLS) float32 softmax probs.

    group_tile = packed rows per grid step (8 samples each) -> default 16384 samples/step.
    """
    B = x.shape[0]
    x2 = x.reshape(B, L_IN)                               # free (drops the unit channel dim)

    # Pack 8 samples per row.  Only pad up to the next multiple of 8 rows (tiny); a
    # non-divisible last grid block is handled by Pallas block clamping/masking.
    Bg = max(-(-B // PACK), PACK)                         # at least 8 packed rows
    pad_rows = Bg * PACK - B
    if pad_rows:
        x2 = jnp.pad(x2, ((0, pad_rows), (0, 0)))
    xg = x2.reshape(Bg, XCOLS)                            # free row-major regroup

    tg = max(PACK, (min(group_tile, Bg) // PACK) * PACK)  # multiple of 8, <= Bg
    grid = (pl.cdiv(Bg, tg),)

    cd = compute_dtype
    a_c, w1_c, w2_c = a_big.astype(cd), w1_big.astype(cd), w2d.astype(cd)  # tiny resident weights

    outg = pl.pallas_call(
        smallcnn_kernel,
        out_shape=jax.ShapeDtypeStruct((Bg, OCOL), jnp.float32),
        grid_spec=pltpu.PrefetchScalarGridSpec(
            num_scalar_prefetch=0,
            grid=grid,
            in_specs=[
                pl.BlockSpec((tg, XCOLS), lambda i: (i, 0)),        # x tile: streamed
                pl.BlockSpec((XCOLS, 2 * LANE), lambda i: (0, 0)),  # weights: resident in VMEM
                pl.BlockSpec((1, LANE), lambda i: (0, 0)),
                pl.BlockSpec((LANE, H1COL), lambda i: (0, 0)),
                pl.BlockSpec((1, H1COL), lambda i: (0, 0)),
                pl.BlockSpec((H1COL, OCOL), lambda i: (0, 0)),
                pl.BlockSpec((1, OCOL), lambda i: (0, 0)),
            ],
            out_specs=pl.BlockSpec((tg, OCOL), lambda i: (i, 0)),
        ),
        compiler_params=pltpu.CompilerParams(
            dimension_semantics=("parallel",),            # v7x: shard batch grid over 2 TCs
            vmem_limit_bytes=48 * 1024 * 1024,            # headroom for large group_tile sweeps (v5e)
        ),
    )(xg, a_c, bconv, w1_c, b1_big, w2_c, b2d)

    return outg.reshape(Bg * PACK, NCLS)[:B]              # free reshape + slice back to (B, NCLS)


def reference_forward(x, w_conv, b_conv, w1_pt, b1_pt, w2_pt, b2_pt):
    """Pure-JAX reference matching PyTorch semantics exactly (PyTorch-shaped weights)."""
    B = x.shape[0]
    xp = jnp.pad(x[:, 0, :], ((0, 0), (1, 1)))
    conv = jnp.stack(
        [sum(w_conv[co, 0, k] * xp[:, k:k + L_IN] for k in range(K)) + b_conv[co]
         for co in range(C_OUT)], axis=1)                       # (B, 2, 14)
    conv = jnp.maximum(conv, 0.0)
    pooled = jnp.maximum(conv[:, :, 0::2], conv[:, :, 1::2])    # (B, 2, 7)
    h = pooled.reshape(B, FLAT)
    h1 = jnp.maximum(h @ w1_pt.T + b1_pt, 0.0)
    logits = h1 @ w2_pt.T + b2_pt
    return jax.nn.softmax(logits, axis=1)


if __name__ == "__main__":
    key = jax.random.PRNGKey(0)
    ks = jax.random.split(key, 6)
    # Deterministic synthetic parameters, PyTorch shapes.
    w_conv = jax.random.normal(ks[0], (C_OUT, 1, K), jnp.float32) * 0.5   # conv1.weight
    b_conv = jax.random.normal(ks[1], (C_OUT,), jnp.float32) * 0.1        # conv1.bias
    w1_pt  = jax.random.normal(ks[2], (H1, FLAT), jnp.float32) * 0.3      # fc1.weight
    b1_pt  = jax.random.normal(ks[3], (H1,), jnp.float32) * 0.1           # fc1.bias
    w2_pt  = jax.random.normal(ks[4], (NCLS, H1), jnp.float32) * 0.3      # fc2.weight
    b2_pt  = jax.random.normal(ks[5], (NCLS,), jnp.float32) * 0.1         # fc2.bias

    params = build_params(np.asarray(w_conv), np.asarray(b_conv),
                          np.asarray(w1_pt), np.asarray(b1_pt),
                          np.asarray(w2_pt), np.asarray(b2_pt))

    cases = [
        # (B, group_tile, compute dtype, rtol, atol)
        (2,    64,  jnp.float32, 1e-5, 1e-5),   # canonical tiny batch (pads up to 8 samples)
        (1000, 32,  jnp.float32, 1e-5, 1e-5),   # ragged: 125 packed rows, non-divisible last block
        (4096, 128, jnp.bfloat16, 0.0, 2e-2),   # bf16 fast path (default dtype), 4 grid steps
    ]
    for B, gt, dt, rtol, atol in cases:
        x = jax.random.normal(jax.random.fold_in(key, 1000 + B), (B, 1, L_IN), jnp.float32)
        out = smallcnn_forward(x, *params, group_tile=gt, compute_dtype=dt)
        jax.block_until_ready(out)
        ref = reference_forward(x, w_conv, b_conv, w1_pt, b1_pt, w2_pt, b2_pt)
        np.testing.assert_allclose(np.asarray(out), np.asarray(ref), rtol=rtol, atol=atol)

    print("KERNEL_OK")
</pallas_src>

<mosaic_0001>
module attributes {stable_mosaic.version = 11 : i64} {
  func.func @smallcnn_kernel(%arg0: i32, %arg1: memref<8x112xf32, #tpu.memory_space<vmem>>, %arg2: memref<112x256xf32, #tpu.memory_space<vmem>>, %arg3: memref<1x128xf32, #tpu.memory_space<vmem>>, %arg4: memref<128x64xf32, #tpu.memory_space<vmem>>, %arg5: memref<1x64xf32, #tpu.memory_space<vmem>>, %arg6: memref<64x16xf32, #tpu.memory_space<vmem>>, %arg7: memref<1x16xf32, #tpu.memory_space<vmem>>, %arg8: memref<8x16xf32, #tpu.memory_space<vmem>>) attributes {dimension_semantics = [#tpu.dimension_semantics<parallel>], iteration_bounds = array<i64: 1>, scalar_prefetch = 0 : i64, scratch_operands = 0 : i64, tpu.core_type = #tpu.core_type<tc>, window_params = [{transform_indices = @transform_0, window_bounds = array<i64: 8, 112>}, {pipeline_mode = #tpu.pipeline_mode<synchronous>, transform_indices = @transform_1, window_bounds = array<i64: 112, 256>}, {pipeline_mode = #tpu.pipeline_mode<synchronous>, transform_indices = @transform_2, window_bounds = array<i64: 1, 128>}, {pipeline_mode = #tpu.pipeline_mode<synchronous>, transform_indices = @transform_3, window_bounds = array<i64: 128, 64>}, {pipeline_mode = #tpu.pipeline_mode<synchronous>, transform_indices = @transform_4, window_bounds = array<i64: 1, 64>}, {pipeline_mode = #tpu.pipeline_mode<synchronous>, transform_indices = @transform_5, window_bounds = array<i64: 64, 16>}, {pipeline_mode = #tpu.pipeline_mode<synchronous>, transform_indices = @transform_6, window_bounds = array<i64: 1, 16>}, {transform_indices = @transform_7, window_bounds = array<i64: 8, 16>}]} {
    %c0 = arith.constant 0 : index
    %c0_0 = arith.constant 0 : index
    %0 = vector.load %arg1[%c0, %c0_0] : memref<8x112xf32, #tpu.memory_space<vmem>>, vector<8x112xf32>
    %c0_1 = arith.constant 0 : index
    %c0_2 = arith.constant 0 : index
    %1 = vector.load %arg2[%c0_1, %c0_2] : memref<112x256xf32, #tpu.memory_space<vmem>>, vector<112x256xf32>
    %cst = arith.constant dense<0.000000e+00> : vector<8x256xf32>
    %2 = tpu.matmul %0, %1, %cst {dimension_numbers = #tpu.dot_dimension_numbers<[1], [0], [0], [1], [0, 0, 1, 1], [], []>} : vector<8x112xf32>, vector<112x256xf32>, vector<8x256xf32> -> vector<8x256xf32>
    %3 = vector.extract_strided_slice %2 {offsets = [0, 0], sizes = [8, 128], strides = [1, 1]} : vector<8x256xf32> to vector<8x128xf32>
    %4 = vector.extract_strided_slice %2 {offsets = [0, 128], sizes = [8, 128], strides = [1, 1]} : vector<8x256xf32> to vector<8x128xf32>
    %5 = arith.maximumf %3, %4 : vector<8x128xf32>
    %c0_3 = arith.constant 0 : index
    %c0_4 = arith.constant 0 : index
    %6 = vector.load %arg3[%c0_3, %c0_4] : memref<1x128xf32, #tpu.memory_space<vmem>>, vector<1x128xf32>
    %7 = vector.broadcast %6 : vector<1x128xf32> to vector<8x128xf32>
    %8 = arith.addf %5, %7 : vector<8x128xf32>
    %cst_5 = arith.constant 0.000000e+00 : f32
    %9 = vector.broadcast %cst_5 : f32 to vector<8x128xf32>
    %10 = arith.maximumf %8, %9 : vector<8x128xf32>
    %c0_6 = arith.constant 0 : index
    %c0_7 = arith.constant 0 : index
    %11 = vector.load %arg4[%c0_6, %c0_7] : memref<128x64xf32, #tpu.memory_space<vmem>>, vector<128x64xf32>
    %cst_8 = arith.constant dense<0.000000e+00> : vector<8x64xf32>
    %12 = tpu.matmul %10, %11, %cst_8 {dimension_numbers = #tpu.dot_dimension_numbers<[1], [0], [0], [1], [0, 0, 1, 1], [], []>} : vector<8x128xf32>, vector<128x64xf32>, vector<8x64xf32> -> vector<8x64xf32>
    %c0_9 = arith.constant 0 : index
    %c0_10 = arith.constant 0 : index
    %13 = vector.load %arg5[%c0_9, %c0_10] : memref<1x64xf32, #tpu.memory_space<vmem>>, vector<1x64xf32>
    %14 = vector.broadcast %13 : vector<1x64xf32> to vector<8x64xf32>
    %15 = arith.addf %12, %14 : vector<8x64xf32>
    %cst_11 = arith.constant 0.000000e+00 : f32
    %16 = vector.broadcast %cst_11 : f32 to vector<8x64xf32>
    %17 = arith.maximumf %15, %16 : vector<8x64xf32>
    %c0_12 = arith.constant 0 : index
    %c0_13 = arith.constant 0 : index
    %18 = vector.load %arg6[%c0_12, %c0_13] : memref<64x16xf32, #tpu.memory_space<vmem>>, vector<64x16xf32>
    %cst_14 = arith.constant dense<0.000000e+00> : vector<8x16xf32>
    %19 = tpu.matmul %17, %18, %cst_14 {dimension_numbers = #tpu.dot_dimension_numbers<[1], [0], [0], [1], [0, 0, 1, 1], [], []>} : vector<8x64xf32>, vector<64x16xf32>, vector<8x16xf32> -> vector<8x16xf32>
    %c0_15 = arith.constant 0 : index
    %c0_16 = arith.constant 0 : index
    %20 = vector.load %arg7[%c0_15, %c0_16] : memref<1x16xf32, #tpu.memory_space<vmem>>, vector<1x16xf32>
    %21 = vector.broadcast %20 : vector<1x16xf32> to vector<8x16xf32>
    %22 = arith.addf %19, %21 : vector<8x16xf32>
    %cst_17 = arith.constant 0.000000e+00 : f32
    %23 = vector.broadcast %cst_17 : f32 to vector<8x16xf32>
    %24 = arith.subf %23, %22 : vector<8x16xf32>
    %25 = math.exp %24 : vector<8x16xf32>
    %cst_18 = arith.constant 1.000000e+00 : f32
    %26 = vector.broadcast %cst_18 : f32 to vector<8x16xf32>
    %27 = arith.addf %26, %25 : vector<8x16xf32>
    %28 = tpu.reciprocal %27 : vector<8x16xf32> -> vector<8x16xf32>
    %c0_19 = arith.constant 0 : index
    %c0_20 = arith.constant 0 : index
    %29 = vector.load %arg8[%c0_19, %c0_20] : memref<8x16xf32, #tpu.memory_space<vmem>>, vector<8x16xf32>
    tpu.vector_store %arg8[%c0_19, %c0_20], %28 {strides = array<i32>} : memref<8x16xf32, #tpu.memory_space<vmem>>, vector<8x16xf32>,
    return
  }
  func.func @transform_0(%arg0: i32) -> (i32, i32) {
    %c0_i32 = arith.constant 0 : i32
    %c0_i32_0 = arith.constant 0 : i32
    return %arg0, %c0_i32 : i32, i32
  }
  func.func @transform_1(%arg0: i32) -> (i32, i32) {
    %c0_i32 = arith.constant 0 : i32
    %c0_i32_0 = arith.constant 0 : i32
    %c0_i32_1 = arith.constant 0 : i32
    return %c0_i32, %c0_i32_0 : i32, i32
  }
  func.func @transform_2(%arg0: i32) -> (i32, i32) {
    %c0_i32 = arith.constant 0 : i32
    %c0_i32_0 = arith.constant 0 : i32
    %c0_i32_1 = arith.constant 0 : i32
    return %c0_i32, %c0_i32_0 : i32, i32
  }
  func.func @transform_3(%arg0: i32) -> (i32, i32) {
    %c0_i32 = arith.constant 0 : i32
    %c0_i32_0 = arith.constant 0 : i32
    %c0_i32_1 = arith.constant 0 : i32
    return %c0_i32, %c0_i32_0 : i32, i32
  }
  func.func @transform_4(%arg0: i32) -> (i32, i32) {
    %c0_i32 = arith.constant 0 : i32
    %c0_i32_0 = arith.constant 0 : i32
    %c0_i32_1 = arith.constant 0 : i32
    return %c0_i32, %c0_i32_0 : i32, i32
  }
  func.func @transform_5(%arg0: i32) -> (i32, i32) {
    %c0_i32 = arith.constant 0 : i32
    %c0_i32_0 = arith.constant 0 : i32
    %c0_i32_1 = arith.constant 0 : i32
    return %c0_i32, %c0_i32_0 : i32, i32
  }
  func.func @transform_6(%arg0: i32) -> (i32, i32) {
    %c0_i32 = arith.constant 0 : i32
    %c0_i32_0 = arith.constant 0 : i32
    %c0_i32_1 = arith.constant 0 : i32
    return %c0_i32, %c0_i32_0 : i32, i32
  }
  func.func @transform_7(%arg0: i32) -> (i32, i32) {
    %c0_i32 = arith.constant 0 : i32
    %c0_i32_0 = arith.constant 0 : i32
    return %arg0, %c0_i32 : i32, i32
  }
}

</mosaic_0001>

<bundles_post_ra>
// kernel: smallcnn_forward.1
= control target key start
LH: loop header
LB: loop body
LE: loop exit
PB: predicated region body
PF: predicated region fallthrough
CT: control target
= control target key end

     0   :  { %v425_v3 = vmov 0.0   ;;  %vm55_vm0 = vcmask 916480   ;;  %vm426_vm1 = vmmov 0   ;;  %vm249_vm2 = vcmask 523264   ;;  %s665_s1 = inlined_call_operand.vmem [shape: f32[112,256], index: 1, kind: input, shape index: {}]   ;;  %s666_s3 = inlined_call_operand.vmem [shape: f32[128,64], index: 3, kind: input, shape index: {}]   ;;  %s667_s0 = inlined_call_operand.vmem [shape: f32[8,112], index: 0, kind: input, shape index: {}]   ;;  %s668_s5 = inlined_call_operand.vmem [shape: f32[64,16], index: 5, kind: input, shape index: {}]   ;;  %s669_s2 = inlined_call_operand.vmem [shape: f32[1,128], index: 2, kind: input, shape index: {}]   ;;  %s670_s4 = inlined_call_operand.vmem [shape: f32[1,64], index: 4, kind: input, shape index: {}]   ;;  %s671_s6 = inlined_call_operand.vmem [shape: f32[1,16], index: 6, kind: input, shape index: {}]   ;;  %s672_s7 = inlined_call_operand.vmem [shape: f32[8,16], index: 7, kind: output, shape index: {}]  }
   0x1   :  { %v54_v0 = vld [vmem:[%s665_s1 + $0xd8] sm:$0xff]  ;;  %v53_v1 = vld [vmem:[%s665_s1 + $0xd0] sm:$0xff]  ;;  %v52_v2 = vld [vmem:[%s665_s1 + $0xc8] sm:$0xff]  ;;  %123 = vmatprep.mubr.f32.mxu0 %v425_v3  ;;  %365 = vmatprep.subr.mxu1 %v425_v3  ;;  %vm328_vm3 = vcmask 130048  }
   0x2   :  { %63 = vmatprep.subr.mxu0 %v54_v0  ;;  %v51_v4 = vld [vmem:[%s665_s1 + $0xc0] sm:$0xff]  ;;  %v50_v5 = vld [vmem:[%s665_s1 + $0xb8] sm:$0xff]  ;;  %v49_v6 = vld [vmem:[%s665_s1 + $0xb0] sm:$0xff]  ;;  %397 = vmatprep.mubr.msk.f32.mxu1 %vm426_vm1, %v425_v3 }
   0x3   :  { %64 = vmatpush1.msra.mxu0 %v53_v1  ;;  %v48_v7 = vld [vmem:[%s665_s1 + $0xa8] sm:$0xff]  ;;  %v47_v8 = vld [vmem:[%s665_s1 + $0xa0] sm:$0xff]  ;;  %v46_v9 = vld [vmem:[%s665_s1 + $0x98] sm:$0xff] }
   0x4   :  { %65 = vmatprep.subr.mxu0 %v52_v2  ;;  %v45_v10 = vld [vmem:[%s665_s1 + $0x90] sm:$0xff]  ;;  %v44_v11 = vld [vmem:[%s665_s1 + $0x88] sm:$0xff]  ;;  %v43_v12 = vld [vmem:[%s665_s1 + $0x80] sm:$0xff] }
   0x5   :  { %66 = vmatpush1.msra.mxu0 %v51_v4  ;;  %v155_v13 = vld [vmem:[%s666_s3 + $0x78] sm:$0xff]  ;;  %v154_v15 = vld [vmem:[%s666_s3 + $0x70] sm:$0xff]  ;;  %v153_v17 = vld [vmem:[%s666_s3 + $0x68] sm:$0xff] }
   0x6   :  { %67 = vmatprep.subr.mxu0 %v50_v5  ;;  %v42_v14 = vld [vmem:[%s665_s1 + $0x78] sm:$0xff]  ;;  %366 = vmatpush3.msra.mxu1 %v155_v13  ;;  %v41_v16 = vld [vmem:[%s665_s1 + $0x70] sm:$0xff]  ;;  %v40_v18 = vld [vmem:[%s665_s1 + $0x68] sm:$0xff] }
   0x7   :  { %68 = vmatpush1.msra.mxu0 %v49_v6  ;;  %367 = vmatprep.subr.mxu1 %v425_v3  ;;  %v39_v19 = vld [vmem:[%s665_s1 + $0x60] sm:$0xff]  ;;  %v38_v21 = vld [vmem:[%s665_s1 + $0x58] sm:$0xff]  ;;  %v37_v22 = vld [vmem:[%s665_s1 + $0x50] sm:$0xff] }
   0x8   :  { %69 = vmatprep.subr.mxu0 %v48_v7  ;;  %368 = vmatpush3.msra.mxu1 %v154_v15  ;;  %v152_v20 = vld [vmem:[%s666_s3 + $0x60] sm:$0xff]  ;;  %v151_v23 = vld [vmem:[%s666_s3 + $0x58] sm:$0xff]  ;;  %v36_v24 = vld [vmem:[%s665_s1 + $0x48] sm:$0xff] }
   0x9   :  { %70 = vmatpush1.msra.mxu0 %v47_v8  ;;  %369 = vmatprep.subr.mxu1 %v425_v3  ;;  %v35_v25 = vld [vmem:[%s665_s1 + $0x40] sm:$0xff]  ;;  %v150_v26 = vld [vmem:[%s666_s3 + $0x50] sm:$0xff]  ;;  %v34_v27 = vld [vmem:[%s665_s1 + $0x38] sm:$0xff] }
   0xa   :  { %71 = vmatprep.subr.mxu0 %v46_v9  ;;  %370 = vmatpush3.msra.mxu1 %v153_v17  ;;  %v33_v28 = vld [vmem:[%s665_s1 + $0x30] sm:$0xff]  ;;  %v149_v29 = vld [vmem:[%s666_s3 + $0x48] sm:$0xff]  ;;  %v31_v31 = vld [vmem:[%s665_s1 + $0x20] sm:$0xff] }
   0xb   :  { %72 = vmatpush1.msra.mxu0 %v45_v10  ;;  %371 = vmatprep.subr.mxu1 %v425_v3  ;;  %v32_v30 = vld [vmem:[%s665_s1 + $0x28] sm:$0xff]  ;;  %v148_v32 = vld [vmem:[%s666_s3 + $0x40] sm:$0xff]  ;;  %v30_v33 = vld [vmem:[%s665_s1 + $0x18] sm:$0xff] }
   0xc   :  { %73 = vmatprep.subr.mxu0 %v44_v11  ;;  %372 = vmatpush3.msra.mxu1 %v152_v20  ;;  %v29_v34 = vld [vmem:[%s665_s1 + $0x10] sm:$0xff]  ;;  %v147_v35 = vld [vmem:[%s666_s3 + $0x38] sm:$0xff]  ;;  %v28_v36 = vld [vmem:[%s665_s1 + $0x8] sm:$0xff] }
   0xd   :  { %74 = vmatpush1.msra.mxu0 %v43_v12  ;;  %373 = vmatprep.subr.mxu1 %v425_v3  ;;  %v27_v37 = vld [vmem:[%s665_s1] sm:$0xff]  ;;  %v146_v38 = vld [vmem:[%s666_s3 + $0x30] sm:$0xff]  ;;  %v145_v40 = vld [vmem:[%s666_s3 + $0x28] sm:$0xff] }
   0xe   :  { %75 = vmatprep.subr.mxu0 %v42_v14  ;;  %374 = vmatpush3.msra.mxu1 %v151_v23  ;;  %v26_v39 = vld [vmem:[%s667_s0] sm:$0xff]  ;;  %v143_v42 = vld [vmem:[%s666_s3 + $0x18] sm:$0xff]  ;;  %v142_v43 = vld [vmem:[%s666_s3 + $0x10] sm:$0xff] }
   0xf   :  { %76 = vmatpush1.msra.mxu0 %v41_v16  ;;  %375 = vmatprep.subr.mxu1 %v425_v3  ;;  %v144_v41 = vld [vmem:[%s666_s3 + $0x20] sm:$0xff]  ;;  %v141_v44 = vld [vmem:[%s666_s3 + $0x8] sm:$0xff]  ;;  %v241_v46 = vld [vmem:[%s668_s5 + $0x38] sm:$0xff] }
  0x10   :  { %77 = vmatprep.subr.mxu0 %v40_v18  ;;  %376 = vmatpush3.msra.mxu1 %v150_v26  ;;  %v140_v45 = vld [vmem:[%s666_s3] sm:$0xff]  ;;  %v240_v47 = vld [vmem:[%s668_s5 + $0x30] sm:$0xff]  ;;  %v239_v48 = vld [vmem:[%s668_s5 + $0x28] sm:$0xff] }
  0x11   :  { %78 = vmatpush1.msra.mxu0 %v39_v19  ;;  %377 = vmatprep.subr.mxu1 %v425_v3  ;;  %v238_v49 = vld [vmem:[%s668_s5 + $0x20] sm:$0xff]  ;;  %v237_v50 = vld [vmem:[%s668_s5 + $0x18] sm:$0xff]  ;;  %v236_v57 = vld [vmem:[%s668_s5 + $0x10] sm:$0xff] }
  0x12   :  { %79 = vmatprep.subr.mxu0 %v38_v21  ;;  %378 = vmatpush3.msra.mxu1 %v149_v29  ;;  %v335_v53 = vld [vmem:[%s669_s2] ss:$0 sm:$0xff]  ;;  %v235_v58 = vld [vmem:[%s668_s5 + $0x8] sm:$0xff] }
  0x13   :  { %80 = vmatpush1.msra.mxu0 %v37_v22  ;;  %379 = vmatprep.subr.mxu1 %v425_v3  ;;  %v234_v59 = vld [vmem:[%s668_s5] sm:$0xff] }
  0x14   :  { %81 = vmatprep.subr.mxu0 %v36_v24  ;;  %380 = vmatpush3.msra.mxu1 %v148_v32  ;;  %v336_v60 = vld [vmem:[%s670_s4] ss:$0 sm:$0xff] }
  0x15   :  { %82 = vmatpush1.msra.mxu0 %v35_v25  ;;  %381 = vmatprep.subr.mxu1 %v425_v3  ;;  %v337_v1 = vld [vmem:[%s671_s6] ss:$0 sm:$0xff] }
  0x16   :  { %83 = vmatprep.subr.mxu0 %v34_v27  ;;  %382 = vmatpush3.msra.mxu1 %v147_v35 }
  0x17   :  { %84 = vmatpush1.msra.mxu0 %v33_v28  ;;  %383 = vmatprep.subr.mxu1 %v425_v3 }
  0x18   :  { %85 = vmatprep.subr.mxu0 %v32_v30  ;;  %384 = vmatpush3.msra.mxu1 %v146_v38 }
  0x19   :  { %86 = vmatpush1.msra.mxu0 %v31_v31  ;;  %385 = vmatprep.subr.mxu1 %v425_v3 }
  0x1a   :  { %87 = vmatprep.subr.mxu0 %v30_v33  ;;  %386 = vmatpush3.msra.mxu1 %v145_v40 }
  0x1b   :  { %88 = vmatpush1.msra.mxu0 %v29_v34  ;;  %387 = vmatprep.subr.mxu1 %v425_v3 }
  0x1c   :  { %89 = vmatprep.subr.mxu0 %v28_v36  ;;  %388 = vmatpush3.msra.mxu1 %v144_v41 }
  0x1d   :  { %90 = vmatpush1.msra.mxu0 %v27_v37  ;;  %389 = vmatprep.subr.mxu1 %v425_v3 }
  0x1e   :  { %334 = vmatmul.mubr.msk.f32.vlgmr.msra.gmra.mxu0 %vm55_vm0, %v26_v39  ;;  %400 = vmatprep.subr.mxu0 %v425_v3 }
  0x1f   :  { %390 = vmatpush3.msra.mxu1 %v143_v42  ;;  %416 = vmatprep.mubr.msk.f32.mxu0 %vm426_vm1, %v425_v3 }
  0x20   :  { %391 = vmatprep.subr.mxu1 %v425_v3  ;;  %401 = vmatpush3.msra.mxu0 %v241_v46 }
  0x21   :  { %392 = vmatpush3.msra.mxu1 %v142_v43  ;;  %402 = vmatprep.subr.mxu0 %v425_v3 }
  0x22   :  { %393 = vmatprep.subr.mxu1 %v425_v3  ;;  %403 = vmatpush3.msra.mxu0 %v240_v47 }
  0x23   :  { %394 = vmatpush3.msra.mxu1 %v141_v44  ;;  %404 = vmatprep.subr.mxu0 %v425_v3 }
  0x24   :  { %395 = vmatprep.subr.mxu1 %v425_v3  ;;  %405 = vmatpush3.msra.mxu0 %v239_v48 }
  0x25   :  { %396 = vmatpush3.msra.mxu1 %v140_v45  ;;  %406 = vmatprep.subr.mxu0 %v425_v3 }
  0x26   :  { %407 = vmatpush3.msra.mxu0 %v238_v49 }
  0x27   :  { %408 = vmatprep.subr.mxu0 %v425_v3 }
  0x28   :  { %409 = vmatpush3.msra.mxu0 %v237_v50 }
  0x29   :  { %410 = vmatprep.subr.mxu0 %v425_v3 }
  0x2a   :  { %411 = vmatpush3.msra.mxu0 %v236_v57 }
  0x2b   :  { %412 = vmatprep.subr.mxu0 %v425_v3 }
  0x2c   :  { %413 = vmatpush3.msra.mxu0 %v235_v58 }
  0x2d   :  { %414 = vmatprep.subr.mxu0 %v425_v3 }
  0x2e   :  { %415 = vmatpush3.msra.mxu0 %v234_v59 }
  0xde   :  { %v125_v51 = vpop.f32.mrf.mxu0 }
  0xe0   :  { %v127_v52 = vpop.f32.mrf.mxu0 }
  0xe1   :  { %v130_v54 = vmax.f32 %v125_v51, %v127_v52 }
  0xe3   :  { %v138_v55 = vadd.f32 %v335_v53, %v130_v54 }
  0xe5   :  { %v139_v56 = vmax.f32 %v138_v55, 0.0 }
  0xe7   :  { %398 = vmatmul.mubr.f32.vlgmr.msra.gmra.mxu1 %v139_v56 }
 0x1a7   :  { %v229_v61 = vpop.f32.mrf.mxu1 }
 0x1a8   :  { %v230_v62 = vadd.f32 %v336_v60, %v229_v61 }
 0x1a9   :  { %v399_v63 = vpop.f32.mrf.mxu1 }
 0x1aa   :  { %v233_v0 = vmax.f32 %v230_v62, 0.0 }
 0x1ac   :  { %417 = vmatmul.mubr.msk.f32.vlgmr.msra.gmra.mxu0 %vm249_vm2, %v233_v0 }
 0x26c   :  { %v319_v2 = vpop.f32.mrf.mxu0 }
 0x26d   :  { %v320_v3 = vadd.f32 %v337_v1, %v319_v2 }
 0x26e   :  { %v418_v4 = vpop.f32.mrf.mxu0 }
 0x26f   :  { %v323_v5 = vsub.f32 0.0, %v320_v3 }
 0x271   :  { %v324_v6 = vmul.f32 1.442695, %v323_v5 }
 0x273   :  { %421 = vpow2.f32 %v324_v6 }
 0x280   :  { %v422_v7 = vpop.eup %421 }
 0x281   :  { %v326_v8 = vadd.f32 1.0, %v422_v7 }
 0x283   :  { %423 = vrcp.f32 %v326_v8 }
 0x290   :  { %v424_v9 = vpop.eup %423 }
 0x291   :  { %329 = vst.msk [vmem:[%s672_s7] sm:$0xff] %vm328_vm3, %v424_v9 }

</bundles_post_ra>
